<compile_context>
chip_gen: v7x
topology: tpu7x:2x2x1
jax: 0.10.0
libtpu: 0.0.40
codegen_flags: <defaults>
</compile_context>

<pallas_src>
import functools
import math

import jax
import jax.numpy as jnp
from jax.experimental import pallas as pl
from jax.experimental.pallas import tpu as pltpu

_LANE = 128


def _sublane(dtype):
    """Sublane multiple for a dtype (packed dtypes occupy 16/32 rows per vreg)."""
    bits = jnp.dtype(dtype).itemsize * 8
    if bits >= 32:
        return 8
    if bits == 16:
        return 16
    return 32


def _cdiv(a, b):
    return -(-a // b)


def _round_up(x, m):
    return _cdiv(x, m) * m


def _tpu_tuning():
    """Returns (VMEM buffer budget bytes, vmem_limit_bytes or None, #TensorCores)."""
    budget, vmem_limit, cores = 8 << 20, None, 1            # v5e-safe default
    try:
        kind = jax.devices()[0].device_kind.lower()
    except Exception:
        return budget, vmem_limit, cores
    if "v6" in kind:                                        # v6e: 32 MiB scoped default
        budget, vmem_limit, cores = 16 << 20, None, 1
    elif "7" in kind:                                       # v7x: 2 TCs, 64 MiB VMEM
        budget, vmem_limit, cores = 32 << 20, 48 << 20, 2
    elif "v4" in kind or "v5p" in kind or kind.endswith("v5"):   # megacore gens
        budget, vmem_limit, cores = 16 << 20, None, 2
    return budget, vmem_limit, cores


def _row_tiling(rows, cols, in_bytes, out_bytes, sub, budget, num_cores):
    """Block-count-first row tiling.  `rows` is a multiple of `sub`."""
    bytes_per_row = 2 * (in_bytes + out_bytes) * cols        # in+out, double-buffered
    target = max(sub, (budget // bytes_per_row) // sub * sub)
    target = min(target, rows)
    grid = _cdiv(rows, target)
    if num_cores > 1 and rows >= num_cores * sub:
        # Keep every TensorCore busy; even tile count balances the split.
        grid = _round_up(max(grid, num_cores), num_cores)
    block_rows = min(rows, _round_up(_cdiv(rows, grid), sub))
    return block_rows, _cdiv(rows, block_rows)


def _lambda_kernel(x_ref, o_ref, *, func):
    # Elementwise map over the whole VMEM tile (VPU path).
    o_ref[...] = func(x_ref[...]).astype(o_ref.dtype)


def lambda_forward(x, func, *, min_pallas_bytes=256 * 1024):
    """Equivalent of Lambda(func).forward(x) for an elementwise `func`."""
    orig_shape = x.shape
    total = math.prod(orig_shape)

    # Output dtype as PyTorch's func(x) would produce it (elementwise only).
    out_aval = jax.eval_shape(func, jax.ShapeDtypeStruct(orig_shape, x.dtype))
    assert out_aval.shape == orig_shape, (
        "Lambda Pallas kernel supports elementwise (shape-preserving) funcs only")
    out_dtype = out_aval.dtype

    in_bytes = jnp.dtype(x.dtype).itemsize
    out_bytes = jnp.dtype(out_dtype).itemsize

    # Small-input fast path: launch + reshape glue dominates -> plain XLA.
    if total == 0 or total * max(in_bytes, out_bytes) < min_pallas_bytes:
        return func(x)

    sub = max(_sublane(x.dtype), _sublane(out_dtype))
    budget, vmem_limit, num_cores = _tpu_tuning()

    # Lane-dense column count.  Prefer one that divides `total` with a
    # sublane-aligned row count so we skip jnp.pad and the tail slice entirely
    # (each is a full extra HBM pass on a bandwidth-bound op).
    cols = None
    for c in (2048, 1024, 512, 256, 128):
        if total % c == 0 and (total // c) % sub == 0:
            cols = c
            break

    flat = x.reshape(-1)
    if cols is not None:
        rows = total // cols
        padded = False
    else:
        cols = 1024
        rows = _round_up(_cdiv(total, cols), sub)            # waste < sub*cols elems
        flat = jnp.pad(flat, (0, rows * cols - total))
        padded = True
    x2d = flat.reshape(rows, cols)

    block_rows, grid = _row_tiling(rows, cols, in_bytes, out_bytes, sub,
                                   budget, num_cores)

    kernel = functools.partial(_lambda_kernel, func=func)
    out2d = pl.pallas_call(
        kernel,
        out_shape=jax.ShapeDtypeStruct((rows, cols), out_dtype),
        grid=(grid,),
        in_specs=[pl.BlockSpec((block_rows, cols), lambda i: (i, 0))],
        out_specs=pl.BlockSpec((block_rows, cols), lambda i: (i, 0)),
        # Donate the input slab when dtypes match (HBM footprint win).
        input_output_aliases={0: 0} if out_dtype == x2d.dtype else {},
        compiler_params=pltpu.CompilerParams(
            dimension_semantics=("parallel",),   # shards tiles across TCs on v7x
            vmem_limit_bytes=vmem_limit,
        ),
    )(x2d)

    out_flat = out2d.reshape(-1)
    if padded:
        out_flat = out_flat[:total]
    return out_flat.reshape(orig_shape)


if __name__ == "__main__":
    key = jax.random.PRNGKey(0)

    # Concrete `func` for this Lambda instance (elementwise example).
    func = lambda t: jnp.maximum(t, 0.0) * 2.0 + 1.0

    # 1) Small NCHW input (batch=2, channels=4, spatial=16): tiny-tensor fast path.
    x_small = jax.random.normal(key, (2, 4, 16, 16), dtype=jnp.float32)
    out_small = jax.block_until_ready(lambda_forward(x_small, func))
    ref_small = func(x_small)
    assert out_small.shape == x_small.shape and out_small.dtype == ref_small.dtype
    assert jnp.allclose(out_small, ref_small, atol=1e-6, rtol=1e-6)

    # 2) Same shape, forced through the Pallas kernel (no-pad / no-slice path).
    out_forced = jax.block_until_ready(
        lambda_forward(x_small, func, min_pallas_bytes=0))
    assert jnp.allclose(out_forced, ref_small, atol=1e-6, rtol=1e-6)

    # 3) Larger aligned input -> default Pallas path, no pad, no tail slice.
    x_big = jax.random.normal(jax.random.PRNGKey(1), (8, 16, 32, 32),
                              dtype=jnp.float32)
    out_big = jax.block_until_ready(lambda_forward(x_big, func))
    assert jnp.allclose(out_big, func(x_big), atol=1e-6, rtol=1e-6)

    # 4) Ragged input -> Pallas pad/slice fallback path (forced through kernel).
    x_rag = jax.random.normal(jax.random.PRNGKey(2), (3, 5, 7, 9),
                              dtype=jnp.float32)
    out_rag = jax.block_until_ready(
        lambda_forward(x_rag, func, min_pallas_bytes=0))
    assert jnp.allclose(out_rag, func(x_rag), atol=1e-6, rtol=1e-6)

    # TODO(synk): Lambda is a generic wrapper; non-elementwise funcs (e.g. pure
    # reshapes like x.view(x.size(0), -1)) have no compute to put in a kernel
    # and are handled as plain-JAX glue outside this path.
    print("KERNEL_OK")
</pallas_src>

<mosaic_0001>
module attributes {stable_mosaic.version = 11 : i64} {
  func.func @_lambda_kernel(%arg0: i32, %arg1: memref<8x256xf32, #tpu.memory_space<vmem>>, %arg2: memref<8x256xf32, #tpu.memory_space<vmem>>) attributes {dimension_semantics = [#tpu.dimension_semantics<parallel>], iteration_bounds = array<i64: 1>, scalar_prefetch = 0 : i64, scratch_operands = 0 : i64, tpu.core_type = #tpu.core_type<tc>, window_params = [{transform_indices = @transform_0, window_bounds = array<i64: 8, 256>}, {transform_indices = @transform_1, window_bounds = array<i64: 8, 256>}]} {
    %c0 = arith.constant 0 : index
    %c0_0 = arith.constant 0 : index
    %0 = vector.load %arg1[%c0, %c0_0] : memref<8x256xf32, #tpu.memory_space<vmem>>, vector<8x256xf32>
    %cst = arith.constant 0.000000e+00 : f32
    %1 = vector.broadcast %cst : f32 to vector<8x256xf32>
    %2 = arith.maximumf %0, %1 : vector<8x256xf32>
    %cst_1 = arith.constant 2.000000e+00 : f32
    %3 = vector.broadcast %cst_1 : f32 to vector<8x256xf32>
    %4 = arith.mulf %2, %3 : vector<8x256xf32>
    %cst_2 = arith.constant 1.000000e+00 : f32
    %5 = vector.broadcast %cst_2 : f32 to vector<8x256xf32>
    %6 = arith.addf %4, %5 : vector<8x256xf32>
    %c0_3 = arith.constant 0 : index
    %c0_4 = arith.constant 0 : index
    %7 = vector.load %arg2[%c0_3, %c0_4] : memref<8x256xf32, #tpu.memory_space<vmem>>, vector<8x256xf32>
    tpu.vector_store %arg2[%c0_3, %c0_4], %6 {strides = array<i32>} : memref<8x256xf32, #tpu.memory_space<vmem>>, vector<8x256xf32>,
    return
  }
  func.func @transform_0(%arg0: i32) -> (i32, i32) {
    %c0_i32 = arith.constant 0 : i32
    %c0_i32_0 = arith.constant 0 : i32
    return %arg0, %c0_i32 : i32, i32
  }
  func.func @transform_1(%arg0: i32) -> (i32, i32) {
    %c0_i32 = arith.constant 0 : i32
    %c0_i32_0 = arith.constant 0 : i32
    return %arg0, %c0_i32 : i32, i32
  }
}

</mosaic_0001>

<bundles_post_ra>
// kernel: tpu_custom_call.1
= control target key start
LH: loop header
LB: loop body
LE: loop exit
PB: predicated region body
PF: predicated region fallthrough
CT: control target
= control target key end

     0   :  { %6 = vsyncpa [#allocation3], 0  ;;  %s132_s0 = inlined_call_operand.hbm [shape: f32[8,256], index: 0, kind: input, shape index: {}, may-alias: {0,1}]   ;;  %s133_s1 = inlined_call_operand.hbm [shape: f32[8,256], index: 1, kind: output, shape index: {}, may-alias: {0,1}]  }
   0x1   :  { %7 = vsyncpa [#allocation4], 0  ;;  %s96_s6 = smov [#allocation2]   ;;  %s48_s10 = scalar_lea.hbm %s132_s0, 256 }
   0x2   :  { %s14_s7 = sshll.u32 %s96_s6, 4  ;;  %p49_p0 = scmp.ne.s32.totalorder %s132_s0, %s48_s10  ;;  %s15_s7 = int_to_ptr.vmem [resolvable:$true] %s14_s7 }
   0x3   :  { %p52_p1 = scmp.lt.u32.totalorder %s48_s10, %s132_s0 }
   0x5   :  { %p54_p2 = pnand %p52_p1, %p49_p0 }
   0x7   :  { %57 = shalt.err (!%p54_p2)
}
   0x8   :  { %s58_s15 = scalar_lea.vmem %s15_s7, 256  ;;  %p63_p4 = scmp.lt.s32.totalorder %s15_s7, %s15_s7 }
   0x9   :  { %p59_p3 = scmp.ne.s32.totalorder %s15_s7, %s58_s15  ;;  %p64_p5 = scmp.lt.s32.totalorder %s58_s15, %s58_s15 }
   0xb   :  { %p65_p6 = por %p64_p5, %p63_p4 }
   0xd   :  { %p66_p7 = pnand %p65_p6, %p59_p3 }
   0xf   :  { %69 = shalt.err (!%p66_p7)
}
  0x10   :  { %17 = dma.hbm_to_vmem [thread:$0]  %s132_s0, 256, %s15_s7, [#allocation3]  }
  0x11   :  { %92 = dma.done.wait [#allocation3], 256  }
  0x12   :  { %93 = vsyncadd [#allocation3], 4294967040  ;;  %v21_v0 = vld [vmem:[#allocation2] sm:$0xff]  ;;  %v22_v1 = vld [vmem:[#allocation2 + $0x8] sm:$0xff]  ;;  %s97_s18 = smov [#allocation5]  }
  0x13   :  { %v23_v2 = vmax.f32 %v21_v0, 0.0  ;;  %v24_v3 = vmax.f32 %v22_v1, 0.0  ;;  %s37_s19 = sshll.u32 %s97_s18, 4  ;;  %s38_s19 = int_to_ptr.vmem [resolvable:$true] %s37_s19 }
  0x14   :  { %s70_s20 = scalar_lea.vmem %s38_s19, 256  ;;  %p75_p9 = scmp.lt.s32.totalorder %s38_s19, %s38_s19 }
  0x15   :  { %v25_v4 = vmul.f32 2.0, %v23_v2  ;;  %v26_v5 = vmul.f32 2.0, %v24_v3  ;;  %p71_p8 = scmp.ne.s32.totalorder %s38_s19, %s70_s20  ;;  %p76_p10 = scmp.lt.s32.totalorder %s70_s20, %s70_s20 }
  0x17   :  { %v27_v6 = vadd.f32 1.0, %v25_v4  ;;  %v28_v7 = vadd.f32 1.0, %v26_v5  ;;  %p77_p11 = por %p76_p10, %p75_p9 }
  0x19   :  { %29 = vst [vmem:[#allocation5] sm:$0xff] %v27_v6  ;;  %30 = vst [vmem:[#allocation5 + $0x8] sm:$0xff] %v28_v7  ;;  %p78_p12 = pnand %p77_p11, %p71_p8 }
  0x1b   :  { %81 = shalt.err (!%p78_p12)
}
  0x1c   :  { %s82_s22 = scalar_lea.hbm %s133_s1, 256 }
  0x1d   :  { %p83_p13 = scmp.ne.s32.totalorder %s133_s1, %s82_s22  ;;  %p86_p0 = scmp.lt.u32.totalorder %s82_s22, %s133_s1 }
  0x1f   :  { %p88_p1 = pnand %p86_p0, %p83_p13 }
  0x21   :  { %91 = shalt.err (!%p88_p1)
}
  0x22   :  { %40 = dma.vmem_to_hbm [thread:$0]  %s38_s19, 256, %s133_s1, [#allocation4]  }
  0x23   :  { %94 = dma.done.wait [#allocation4], 256  }
  0x24   :  { %95 = vsyncadd [#allocation4], 4294967040 }
  0x25   :  { %44 = vsyncpa [#allocation3], 1 }
  0x26   :  { %45 = vsyncpa [#allocation4], 1 }

</bundles_post_ra>
